<compile_context>
chip_gen: v7x
topology: tpu7x:2x2x1
jax: 0.10.0
libtpu: 0.0.40
codegen_flags: <defaults>
</compile_context>

<pallas_src>
import jax
import jax.numpy as jnp
from jax.experimental import pallas as pl
from jax.experimental.pallas import tpu as pltpu

HIDDEN = 64
SUBLANE = 8          # f32 sublane granularity (second-to-last dim)
MAX_TILE_B = 512     # 256-512 row tiles already reach ~85% of HBM roofline


def _round_up(n, m):
    return ((n + m - 1) // m) * m


def _vmem_capacity_bytes():
    try:
        return int(pltpu.get_tpu_info().vmem_capacity_bytes)
    except Exception:
        return 64 << 20     # conservative default: v7x per-TC VMEM


def _pick_tile_b(B):
    """Whole batch only when tiny; otherwise >=2 (target ~4) grid steps, <=512 rows."""
    if B < 2 * SUBLANE:
        return B
    tile = _round_up(-(-B // 4), SUBLANE)        # aim for ~4 grid steps
    return max(SUBLANE, min(MAX_TILE_B, tile))


def _resident_spec(shape):
    """Fully-resident operand (constant block index): single-buffered when supported."""
    index_map = lambda i: (0,) * len(shape)
    try:
        return pl.BlockSpec(shape, index_map, pipeline_mode=pl.Buffered(1))
    except TypeError:       # older BlockSpec without pipeline_mode kwarg
        return pl.BlockSpec(shape, index_map)


def weight_mlp_kernel(x_ref, w1_ref, b1_ref, w2_ref, b2_ref, o_ref):
    # x_ref: (TB, F)  w1_ref: (F, H)  b1_ref: (1, H)  w2_ref: (H, F)  b2_ref: (1, F)
    x = x_ref[...]

    # layer1 + ReLU
    h = jnp.dot(x, w1_ref[...], preferred_element_type=jnp.float32) + b1_ref[...]
    h = jnp.maximum(h, 0.0)

    # layer2
    y = jnp.dot(h, w2_ref[...], preferred_element_type=jnp.float32) + b2_ref[...]

    # numerically stable softmax over the native F columns
    m = jnp.max(y, axis=-1, keepdims=True)
    e = jnp.exp(y - m)
    denom = jnp.sum(e, axis=-1, keepdims=True)
    inv = pl.reciprocal(denom, approx=True)      # EUP vrcp (free slot)
    inv = inv * (2.0 - denom * inv)              # one Newton step -> ~f32 accuracy
    o_ref[...] = (e * inv).astype(o_ref.dtype)


def weight_mlp(x, w1, b1, w2, b2, *, tile_b=None):
    """x: (B, F) f32. w1: (F, H), b1: (H,), w2: (H, F), b2: (F,) — (in, out) layout."""
    B, F = x.shape
    H = w1.shape[1]

    if tile_b is None:
        tile_b = _pick_tile_b(B)
    tile_b = max(1, min(int(tile_b), B))
    if tile_b != B:
        tile_b = max(SUBLANE, _round_up(tile_b, SUBLANE))

    # VMEM footprint (per-TC): resident weights (single-buffered) + double-buffered
    # x/out tiles + in-kernel intermediates (h, y, e, normalized result).
    weight_bytes = (F * H + H + H * F + F) * 4
    budget = min(_vmem_capacity_bytes() // 2, 48 << 20)   # ~32 MiB on v7x, 48 MiB elsewhere

    def footprint(tb):
        stream = 2 * 2 * tb * F * 4          # x + out, double-buffered
        temps = (tb * H + 3 * tb * F) * 4    # h, y, e (+ result)
        return weight_bytes + stream + temps

    while tile_b > SUBLANE and footprint(tile_b) > budget:
        tile_b = max(SUBLANE, _round_up(tile_b // 2, SUBLANE))

    # Pad only the batch dim up to a multiple of the tile (never a whole-batch tile).
    Bp = _round_up(B, tile_b)
    x_in = x if Bp == B else jnp.pad(x, ((0, Bp - B), (0, 0)))

    b1_r = b1.reshape(1, H)
    b2_r = b2.reshape(1, F)

    vmem_limit = int(min(max(4 * footprint(tile_b), 16 << 20), budget))
    grid = (Bp // tile_b,)

    cost = pl.CostEstimate(
        flops=4 * Bp * F * H,                 # two matmuls
        transcendentals=Bp * F,               # exp
        bytes_accessed=8 * Bp * F + weight_bytes,
    )

    out = pl.pallas_call(
        weight_mlp_kernel,
        out_shape=jax.ShapeDtypeStruct((Bp, F), jnp.float32),
        grid_spec=pltpu.PrefetchScalarGridSpec(
            num_scalar_prefetch=0,
            grid=grid,
            in_specs=[
                pl.BlockSpec((tile_b, F), lambda i: (i, 0)),  # x tile (streamed)
                _resident_spec((F, H)),                       # w1 (resident)
                _resident_spec((1, H)),                       # b1 (resident)
                _resident_spec((H, F)),                       # w2 (resident)
                _resident_spec((1, F)),                       # b2 (resident)
            ],
            out_specs=pl.BlockSpec((tile_b, F), lambda i: (i, 0)),
        ),
        compiler_params=pltpu.CompilerParams(
            dimension_semantics=("parallel",),   # >=2 grid steps -> shards across TCs
            vmem_limit_bytes=vmem_limit,
        ),
        cost_estimate=cost,
    )(x_in, w1, b1_r, w2, b2_r)

    return out if Bp == B else out[:B]


def init_params(key, input_size, hidden=HIDDEN):
    """Deterministic init mimicking PyTorch nn.Linear default U[-1/sqrt(fan_in), 1/sqrt(fan_in)]."""
    k1, k2, k3, k4 = jax.random.split(key, 4)
    bound1 = 1.0 / jnp.sqrt(input_size)
    bound2 = 1.0 / jnp.sqrt(hidden)
    # Stored already transposed relative to PyTorch: (in, out).
    w1 = jax.random.uniform(k1, (input_size, hidden), jnp.float32, -bound1, bound1)
    b1 = jax.random.uniform(k2, (hidden,), jnp.float32, -bound1, bound1)
    w2 = jax.random.uniform(k3, (hidden, input_size), jnp.float32, -bound2, bound2)
    b2 = jax.random.uniform(k4, (input_size,), jnp.float32, -bound2, bound2)
    return w1, b1, w2, b2


def reference(x, w1, b1, w2, b2):
    h = jnp.maximum(x @ w1 + b1, 0.0)
    y = h @ w2 + b2
    return jax.nn.softmax(y, axis=-1)


if __name__ == "__main__":
    key = jax.random.PRNGKey(0)
    kx, kp, kx2 = jax.random.split(key, 3)

    batch, input_size = 16, 32
    x = jax.random.normal(kx, (batch, input_size), jnp.float32)
    w1, b1, w2, b2 = init_params(kp, input_size)

    out = jax.block_until_ready(weight_mlp(x, w1, b1, w2, b2))
    ref = reference(x, w1, b1, w2, b2)
    assert out.shape == (batch, input_size)
    assert jnp.allclose(jnp.sum(out, axis=-1), 1.0, atol=1e-5)
    assert jnp.allclose(out, ref, atol=1e-5, rtol=1e-5)

    # Awkward batch (not a multiple of the tile) exercises the batch pad-and-slice path.
    x2 = jax.random.normal(kx2, (19, input_size), jnp.float32)
    out2 = jax.block_until_ready(weight_mlp(x2, w1, b1, w2, b2))
    assert jnp.allclose(out2, reference(x2, w1, b1, w2, b2), atol=1e-5, rtol=1e-5)

    print("KERNEL_OK")
</pallas_src>

<mosaic_0001>
module attributes {stable_mosaic.version = 11 : i64} {
  func.func @weight_mlp_kernel(%arg0: i32, %arg1: memref<8x32xf32, #tpu.memory_space<vmem>>, %arg2: memref<32x64xf32, #tpu.memory_space<vmem>>, %arg3: memref<1x64xf32, #tpu.memory_space<vmem>>, %arg4: memref<64x32xf32, #tpu.memory_space<vmem>>, %arg5: memref<1x32xf32, #tpu.memory_space<vmem>>, %arg6: memref<8x32xf32, #tpu.memory_space<vmem>>) attributes {dimension_semantics = [#tpu.dimension_semantics<parallel>], iteration_bounds = array<i64: 2>, scalar_prefetch = 0 : i64, scratch_operands = 0 : i64, tpu.core_type = #tpu.core_type<tc>, window_params = [{transform_indices = @transform_0, window_bounds = array<i64: 8, 32>}, {pipeline_mode = #tpu.pipeline_mode<synchronous>, transform_indices = @transform_1, window_bounds = array<i64: 32, 64>}, {pipeline_mode = #tpu.pipeline_mode<synchronous>, transform_indices = @transform_2, window_bounds = array<i64: 1, 64>}, {pipeline_mode = #tpu.pipeline_mode<synchronous>, transform_indices = @transform_3, window_bounds = array<i64: 64, 32>}, {pipeline_mode = #tpu.pipeline_mode<synchronous>, transform_indices = @transform_4, window_bounds = array<i64: 1, 32>}, {transform_indices = @transform_5, window_bounds = array<i64: 8, 32>}]} {
    %c0 = arith.constant 0 : index
    %c0_0 = arith.constant 0 : index
    %0 = vector.load %arg1[%c0, %c0_0] : memref<8x32xf32, #tpu.memory_space<vmem>>, vector<8x32xf32>
    %c0_1 = arith.constant 0 : index
    %c0_2 = arith.constant 0 : index
    %1 = vector.load %arg2[%c0_1, %c0_2] : memref<32x64xf32, #tpu.memory_space<vmem>>, vector<32x64xf32>
    %cst = arith.constant dense<0.000000e+00> : vector<8x64xf32>
    %2 = tpu.matmul %0, %1, %cst {dimension_numbers = #tpu.dot_dimension_numbers<[1], [0], [0], [1], [0, 0, 1, 1], [], []>} : vector<8x32xf32>, vector<32x64xf32>, vector<8x64xf32> -> vector<8x64xf32>
    %c0_3 = arith.constant 0 : index
    %c0_4 = arith.constant 0 : index
    %3 = vector.load %arg3[%c0_3, %c0_4] : memref<1x64xf32, #tpu.memory_space<vmem>>, vector<1x64xf32>
    %4 = vector.broadcast %3 : vector<1x64xf32> to vector<8x64xf32>
    %5 = arith.addf %2, %4 : vector<8x64xf32>
    %cst_5 = arith.constant 0.000000e+00 : f32
    %6 = vector.broadcast %cst_5 : f32 to vector<8x64xf32>
    %7 = arith.maximumf %5, %6 : vector<8x64xf32>
    %c0_6 = arith.constant 0 : index
    %c0_7 = arith.constant 0 : index
    %8 = vector.load %arg4[%c0_6, %c0_7] : memref<64x32xf32, #tpu.memory_space<vmem>>, vector<64x32xf32>
    %cst_8 = arith.constant dense<0.000000e+00> : vector<8x32xf32>
    %9 = tpu.matmul %7, %8, %cst_8 {dimension_numbers = #tpu.dot_dimension_numbers<[1], [0], [0], [1], [0, 0, 1, 1], [], []>} : vector<8x64xf32>, vector<64x32xf32>, vector<8x32xf32> -> vector<8x32xf32>
    %c0_9 = arith.constant 0 : index
    %c0_10 = arith.constant 0 : index
    %10 = vector.load %arg5[%c0_9, %c0_10] : memref<1x32xf32, #tpu.memory_space<vmem>>, vector<1x32xf32>
    %11 = vector.broadcast %10 : vector<1x32xf32> to vector<8x32xf32>
    %12 = arith.addf %9, %11 : vector<8x32xf32>
    %cst_11 = arith.constant dense<0xFF800000> : vector<8xf32>
    %13 = vector.multi_reduction <maximumf>, %12, %cst_11 [1] : vector<8x32xf32> to vector<8xf32>
    %14 = vector.shape_cast %13 : vector<8xf32> to vector<8x1xf32>
    %15 = vector.broadcast %14 : vector<8x1xf32> to vector<8x32xf32>
    %16 = arith.subf %12, %15 : vector<8x32xf32>
    %17 = math.exp %16 : vector<8x32xf32>
    %cst_12 = arith.constant dense<0.000000e+00> : vector<8xf32>
    %18 = vector.multi_reduction <add>, %17, %cst_12 [1] : vector<8x32xf32> to vector<8xf32>
    %19 = vector.shape_cast %18 : vector<8xf32> to vector<8x1xf32>
    %20 = tpu.reciprocal %19 {approx = true} : vector<8x1xf32> -> vector<8x1xf32>
    %21 = arith.mulf %19, %20 : vector<8x1xf32>
    %cst_13 = arith.constant 2.000000e+00 : f32
    %22 = vector.broadcast %cst_13 : f32 to vector<8x1xf32>
    %23 = arith.subf %22, %21 : vector<8x1xf32>
    %24 = arith.mulf %20, %23 : vector<8x1xf32>
    %25 = vector.broadcast %24 : vector<8x1xf32> to vector<8x32xf32>
    %26 = arith.mulf %17, %25 : vector<8x32xf32>
    %c0_14 = arith.constant 0 : index
    %c0_15 = arith.constant 0 : index
    %27 = vector.load %arg6[%c0_14, %c0_15] : memref<8x32xf32, #tpu.memory_space<vmem>>, vector<8x32xf32>
    tpu.vector_store %arg6[%c0_14, %c0_15], %26 {strides = array<i32>} : memref<8x32xf32, #tpu.memory_space<vmem>>, vector<8x32xf32>,
    return
  }
  func.func @transform_0(%arg0: i32) -> (i32, i32) {
    %c0_i32 = arith.constant 0 : i32
    %c0_i32_0 = arith.constant 0 : i32
    return %arg0, %c0_i32 : i32, i32
  }
  func.func @transform_1(%arg0: i32) -> (i32, i32) {
    %c0_i32 = arith.constant 0 : i32
    %c0_i32_0 = arith.constant 0 : i32
    %c0_i32_1 = arith.constant 0 : i32
    return %c0_i32, %c0_i32_0 : i32, i32
  }
  func.func @transform_2(%arg0: i32) -> (i32, i32) {
    %c0_i32 = arith.constant 0 : i32
    %c0_i32_0 = arith.constant 0 : i32
    %c0_i32_1 = arith.constant 0 : i32
    return %c0_i32, %c0_i32_0 : i32, i32
  }
  func.func @transform_3(%arg0: i32) -> (i32, i32) {
    %c0_i32 = arith.constant 0 : i32
    %c0_i32_0 = arith.constant 0 : i32
    %c0_i32_1 = arith.constant 0 : i32
    return %c0_i32, %c0_i32_0 : i32, i32
  }
  func.func @transform_4(%arg0: i32) -> (i32, i32) {
    %c0_i32 = arith.constant 0 : i32
    %c0_i32_0 = arith.constant 0 : i32
    %c0_i32_1 = arith.constant 0 : i32
    return %c0_i32, %c0_i32_0 : i32, i32
  }
  func.func @transform_5(%arg0: i32) -> (i32, i32) {
    %c0_i32 = arith.constant 0 : i32
    %c0_i32_0 = arith.constant 0 : i32
    return %arg0, %c0_i32 : i32, i32
  }
}

</mosaic_0001>

<bundles_post_ra>
// kernel: tpu_custom_call.1
= control target key start
LH: loop header
LB: loop body
LE: loop exit
PB: predicated region body
PF: predicated region fallthrough
CT: control target
= control target key end

     0   :  { %10 = vsyncpa [#allocation3], 0  ;;  %s850_s0 = inlined_call_operand.vmem [shape: f32[16,32], index: 0, kind: input, shape index: {}]   ;;  %s851_s1 = inlined_call_operand.vmem [shape: f32[32,64], index: 1, kind: input, shape index: {}]   ;;  %s852_s2 = inlined_call_operand.vmem [shape: f32[1,64], index: 2, kind: input, shape index: {}]   ;;  %s853_s3 = inlined_call_operand.vmem [shape: f32[64,32], index: 3, kind: input, shape index: {}]   ;;  %s854_s4 = inlined_call_operand.vmem [shape: f32[1,32], index: 4, kind: input, shape index: {}]   ;;  %s855_s5 = inlined_call_operand.hbm [shape: f32[16,32], index: 5, kind: output, shape index: {}]  }
   0x1   :  { %12 = vsyncpa [#allocation3 + $0x1], 0  ;;  %s704_s18 = smov 0   ;;  %s706_s19 = smov 0  }
   0x2   :  { %s708_s20 = smov 0   ;;  %s710_s21 = smov 0  }
   0x3 LB: > { %s725_s22 = sadd.s32 4294967295, %s668_s21   ;;  %s484_s23 = sadd.s32 4294967294, %s668_s21   ;;  %s668_s21 = sphi %s710_s21, %s861_s21   ;;  %s664_s20 = sphi %s708_s20, %s860_s20   ;;  %s660_s19 = sphi %s706_s19, %s859_s19   ;;  %s656_s18 = sphi %s704_s18, %s858_s18  }
   0x4   : > { %s729_s24 = sadd.s32 1, %s668_s21   ;;  %s135_s25 = sadd.s32 1, %s664_s20 }
   0x5   : > { %s132_s26 = ssub.s32 %s668_s21, %s729_s24  ;;  %p145_p0 = scmp.ne.s32.totalorder %s664_s20, %s660_s19 }
   0x6   : > { %p133_p1 = scmp.eq.s32.totalorder %s132_s26, 0  ;;  %p146_p2 = scmp.eq.s32.totalorder %s725_s22, 1 }
   0x7   : > { %p151_p3 = scmp.ne.s32.totalorder %s660_s19, %s656_s18  ;;  %p152_p4 = scmp.eq.s32.totalorder %s484_s23, 1 }
   0x8   : > { %s740_s27 = scalar_select %p133_p1, %s664_s20, %s135_s25  }
   0x9   : > { %p742_p5 = por %p146_p2, %p145_p0  ;;  %p746_p6 = por %p152_p4, %p151_p3 }
   0xa   : > { %p487_p7 = scmp.ge.s32.totalorder %s668_s21, 1  ;;  %p189_p8 = scmp.lt.s32.totalorder %s668_s21, 3 }
   0xc   : > { %p190_p9 = pnand %p487_p7, %p189_p8 }
   0xd   : > { %v221_v0 = vld [vmem:[%s851_s1] sm:$0xff] (!%p190_p9)  ;;  %v222_v1 = vld [vmem:[%s851_s1 + $0x8] sm:$0xff] (!%p190_p9)  ;;  %v223_v2 = vld [vmem:[%s851_s1 + $0x10] sm:$0xff] (!%p190_p9)  ;;  %v670_v3 = vmov (!%p190_p9), 0.0|0.0   ;;  %vm671_vm0 = vmmov (!%p190_p9), 0   ;;  %v672_v6 = vmov (!%p190_p9), 0.0  }
   0xe   : > { %193 = sbr.rel (%p190_p9) target bundleno = 790 (0x316), region = 40  ;;  %542 = vmatprep.subr.bf16.mxu0 (!%p190_p9), %v670_v3  ;;  %v543_v4 = vpack.c.bf16 (!%p190_p9), %v222_v1, %v221_v0  ;;  %v224_v5 = vld [vmem:[%s851_s1 + $0x18] sm:$0xff] (!%p190_p9)  ;;  %520 = vmatprep.mubr.msk.f32.mxu0 (!%p190_p9), %vm671_vm0, %v672_v6  ;;  %p216_p10 = scmp.lt.s32.totalorder (!%p190_p9), %s725_s22, 1  ;;  %v307_v7 = vld [vmem:[%s853_s3] sm:$0xff] (!%p190_p9)  ;;  %v308_v8 = vld [vmem:[%s853_s3 + $0x8] sm:$0xff] (!%p190_p9)  ;;  %vm232_vm1 = vcmask (!%p190_p9), 261120  }
   0xf   : > { %548 = vmatprep.subr.bf16.mxu1 (!%p190_p9), %v670_v3  ;;  %v549_v9 = vpack.c.bf16 (!%p190_p9), %v308_v8, %v307_v7  ;;  %v309_v10 = vld [vmem:[%s853_s3 + $0x10] sm:$0xff] (!%p190_p9)  ;;  %v310_v11 = vld [vmem:[%s853_s3 + $0x18] sm:$0xff] (!%p190_p9)  ;;  %539 = vmatprep.mubr.msk.f32.mxu1 (!%p190_p9), %vm671_vm0, %v672_v6  ;;  %v546_v12 = vpack.c.bf16 (!%p190_p9), %v224_v5, %v223_v2  ;;  %v311_v14 = vld [vmem:[%s853_s3 + $0x20] sm:$0xff] (!%p190_p9)  ;;  %vm322_vm2 = vcmask (!%p190_p9), 523264   ;;  %s495_s8 = sshll.u32 (!%p190_p9), %s725_s22, 7 }
  0x10   : > { %544 = vmatpush3.bf16.msra.mxu0 (!%p190_p9), %v543_v4  ;;  %v552_v13 = vpack.c.bf16 (!%p190_p9), %v310_v11, %v309_v10  ;;  %v312_v15 = vld [vmem:[%s853_s3 + $0x28] sm:$0xff] (!%p190_p9)  ;;  %v313_v18 = vld [vmem:[%s853_s3 + $0x30] sm:$0xff] (!%p190_p9)  ;;  %v314_v19 = vld [vmem:[%s853_s3 + $0x38] sm:$0xff] (!%p190_p9) }
  0x11   : > { %545 = vmatprep.subr.bf16.mxu0 (!%p190_p9), %v670_v3  ;;  %550 = vmatpush3.bf16.msra.mxu1 (!%p190_p9), %v549_v9  ;;  %v555_v17 = vpack.c.bf16 (!%p190_p9), %v312_v15, %v311_v14  ;;  %v558_v20 = vpack.c.bf16 (!%p190_p9), %v314_v19, %v313_v18  ;;  %v490_v21 = vld [vmem:[%s852_s2] ss:$0 sm:$0xff] (!%p190_p9) }
  0x12   : > { %551 = vmatprep.subr.bf16.mxu1 (!%p190_p9), %v670_v3  ;;  %v492_v26 = vld [vmem:[%s854_s4] ss:$0 sm:$0xff] (!%p190_p9) }
  0x14   : > { %547 = vmatpush3.bf16.msra.mxu0 (!%p190_p9), %v546_v12 }
  0x15   : > { %s217_s30 = scalar_select %p216_p10, %s725_s22, 1  ;;  %553 = vmatpush3.bf16.msra.mxu1 %v552_v13 }
  0x16   : > { %554 = vmatprep.subr.bf16.mxu1 %v670_v3  ;;  %s673_s22 = smov [#allocation2]  }
  0x17   : > { %s489_s6 = sshll.u32 %s217_s30, 3  ;;  %s610_s16 = sshll.u32 %s673_s22, 4  ;;  %s611_s16 = int_to_ptr.vmem [resolvable:$false] %s610_s16 }
  0x18   : > { %s219_s13 = scalar_lea.vmem %s850_s0, %s489_s6  ;;  %s213_s6 = sand.u32 1, %s660_s19  }
  0x19   : > { %v220_v16 = vld [vmem:[%s219_s13] sm:$0xff]  ;;  %556 = vmatpush3.bf16.msra.mxu1 %v555_v17  ;;  %s488_s7 = sshll.u32 %s213_s6, 3  ;;  %s807_s13 = scalar_lea.hbm %s855_s5, %s495_s8 }
  0x1a   : > { %521 = vmatmul.mubr.msk.f32.vlgmr.msra.gmra.mrb[0].mxu0 %vm232_vm1, %v220_v16  ;;  %557 = vmatprep.subr.bf16.mxu1 %v670_v3  ;;  %s215_s9 = scalar_lea.vmem [#allocation2], %s488_s7  ;;  %s412_s14 = scalar_lea.sflag [#allocation3], %s213_s6 }
  0x1b   : > { %s425_s10 = sshll.u32 %s215_s9, 4  ;;  %s612_s17 = scalar_lea.vmem %s611_s16, 256  ;;  %s809_s10 = int_to_ptr.vmem [resolvable:$true] %s425_s10 }
  0x1c   : > { %s606_s15 = scalar_lea.vmem %s809_s10, 128  ;;  %p613_p0 = scmp.lt.s32.totalorder %s809_s10, %s611_s16 }
  0x1d   : > { %559 = vmatpush3.bf16.msra.mxu1 %v558_v20  ;;  %p607_p11 = scmp.ne.s32.totalorder %s809_s10, %s606_s15  ;;  %p614_p1 = scmp.lt.s32.totalorder %s612_s17, %s606_s15 }
  0x1f   : > { %p608_p12 = pnand %p607_p11, %p742_p5  ;;  %p615_p2 = por %p614_p1, %p613_p0 }
  0x21   : > { %p609_p13 = pneg %p608_p12 }
  0x23   : > { %p616_p3 = pnand %p615_p2, %p609_p13 }
  0xed   : > { %v302_v22 = vpop.f32.mrb[0].mxu0 }
  0xee   : > { %v303_v23 = vadd.f32 %v490_v21, %v302_v22  ;;  %v522_v24 = vpop.f32.mrb[1].mxu0 }
  0xf0   : > { %v306_v25 = vmax.f32 %v303_v23, 0.0 }
  0xf2   : > { %540 = vmatmul.mubr.msk.f32.vlgmr.msra.gmra.mrb[0].mxu1 %vm322_vm2, %v306_v25 }
 0x1c5   : > { %v392_v27 = vpop.f32.mrb[0].mxu1 }
 0x1c6   : > { %v393_v28 = vadd.f32 %v492_v26, %v392_v27  ;;  %v541_v29 = vpop.f32.mrb[1].mxu1 }
 0x1c8   : > { %v396_v30 = vsel %vm232_vm1, %v393_v28, -inf }
 0x1c9   : > { %397 = vmax.xlane.f32.xlu0 %v396_v30 }
 0x256   : > { %v398_v31 = vpop.xlane.xlu0 %397 }
 0x257   : > { %v399_v32 = vsub.f32 %v393_v28, %v398_v31 }
 0x259   : > { %v400_v33 = vmul.f32 1.442695, %v399_v32 }
 0x25b   : > { %602 = vpow2.f32 %v400_v33 }
 0x265   : > { %v603_v34 = vpop.eup %602 }
 0x266   : > { %v402_v35 = vsel %vm232_vm1, %v603_v34, 0.0 }
 0x267   : > { %403 = vadd.xlane.f32.xlu0 %v402_v35 }
 0x2f4   : > { %v404_v36 = vpop.xlane.xlu0 %403 }
 0x2f5   : > { %604 = vrcp.f32 %v404_v36 }
 0x2ff   : > { %v605_v37 = vpop.eup %604 }
 0x300   : > { %v406_v38 = vmul.f32 %v605_v37, %v404_v36 }
 0x302   : > { %v407_v39 = vsub.f32 2.0, %v406_v38 }
 0x304   : > { %v408_v40 = vmul.f32 %v605_v37, %v407_v39 }
 0x306   : > { %v409_v41 = vmul.f32 %v603_v34, %v408_v40 }
 0x308   : > { %410 = vst.msk [vmem:[%s215_s9] sm:$0xff] %vm232_vm1, %v409_v41 }
 0x309   : > { %619 = shalt.err (!%p616_p3)
}
 0x30a   : > { %s620_s23 = scalar_lea.hbm %s807_s13, 128  ;;  %s624_s30 = scalar_lea.hbm %s855_s5, 256 }
 0x30b   : > { %p621_p4 = scmp.ne.s32.totalorder %s807_s13, %s620_s23  ;;  %p625_p9 = scmp.lt.u32.totalorder %s807_s13, %s855_s5 }
 0x30c   : > { %p626_p10 = scmp.lt.u32.totalorder %s624_s30, %s620_s23  ;;  %p628_p12 = scmp.lt.u32.totalorder %s620_s23, %s807_s13 }
 0x30d   : > { %p622_p7 = pnand %p621_p4, %p742_p5 }
 0x30e   : > { %p627_p11 = por %p626_p10, %p625_p9 }
 0x30f   : > { %p623_p8 = pneg %p622_p7 }
 0x310   : > { %p629_p13 = por %p628_p12, %p627_p11 }
 0x312   : > { %p630_p0 = pnand %p629_p13, %p623_p8 }
 0x314   : > { %633 = shalt.err (!%p630_p0)
}
 0x315   : > { %560 = dma.vmem_to_hbm [thread:$0]  (%p742_p5), %s809_s10, 128, %s807_s13, %s412_s14  }
 0x316 PF: > { %p566_p1 = scmp.ge.s32.totalorder %s668_s21, 2  ;;  %s437_s8 = sand.u32 1, %s656_s18  }
 0x317   : > { %s438_s9 = scalar_lea.sflag [#allocation3], %s437_s8 }
 0x318   : > { %p563_p2 = pnand %p566_p1, %p746_p6 }
 0x31a   : > { %651 = dma.done.wait (!%p563_p2), %s438_s9, 128  }
 0x31b   : > { %653 = vsyncadd (!%p563_p2), %s438_s9, 4294967168  ;;  %p15_p3 = scmp.ge.s32.totalorder %s729_s24, 4   ;;  %s858_s18 = smov %s660_s19 }
 0x31c   : > { %s859_s19 = smov %s664_s20  ;;  %s860_s20 = smov %s740_s27 }
 0x31d   : > { %s861_s21 = smov %s729_s24  ;;  %17 = sbr.rel (!%p15_p3) target bundleno = 3 (0x3), region = 75 }
 0x324   :  { %443 = vsyncpa [#allocation3], 1 }
 0x325   :  { %445 = vsyncpa [#allocation3 + $0x1], 1 }

</bundles_post_ra>
